<compile_context>
chip_gen: v5e
topology: v5e:2x2
jax: 0.10.0
libtpu: 0.0.40
codegen_flags: <defaults>
</compile_context>

<pallas_src>
import math

import jax
import jax.numpy as jnp
from jax.experimental import pallas as pl
from jax.experimental.pallas import tpu as pltpu


# ---------------------------------------------------------------------------
# Kernels
# ---------------------------------------------------------------------------
def time_embeddings_smem_kernel(t_ref, inv_freq_ref, phase_ref, o_ref):
    """Small-batch path: t_ref is a (B,) SMEM vector of scalar times."""
    B, _ = o_ref.shape
    inv_freq = inv_freq_ref[...]   # (1, D) — loaded once, shared by all rows
    phase = phase_ref[...]         # (1, D)
    for b in range(B):             # B is tiny and static; unrolled at trace time
        t = t_ref[b]               # scalar read from SMEM, splat by broadcast
        o_ref[pl.ds(b, 1), :] = jnp.sin(t * inv_freq + phase)


def time_embeddings_grid_kernel(t_ref, inv_freq_ref, phase_ref, o_ref):
    """Large-batch path: t_ref (TB, 1), tables (1, D), o_ref (TB, D)."""
    o_ref[...] = jnp.sin(t_ref[...] * inv_freq_ref[...] + phase_ref[...])


# ---------------------------------------------------------------------------
# Wrapper
# ---------------------------------------------------------------------------
def time_embeddings_forward(times, dim=1280):
    """times: scalar or (B,) float32.

    Returns (B, dim) float32; a scalar input gives (1, dim), matching the
    PyTorch module's output shape.
    """
    times = jnp.atleast_1d(jnp.asarray(times, jnp.float32))
    B = times.shape[0]

    # Hoisted, t-independent tables (constant-folded by XLA; ~5 KB each).
    idx = jnp.arange(dim)
    power = 2.0 * (idx // 2).astype(jnp.float32) / dim
    inv_freq = (1.0 / (10000.0 ** power)).reshape(1, dim)
    # cos(x) == sin(x + pi/2): phase is pi/2 on odd lanes, 0 on even lanes.
    phase = ((idx % 2).astype(jnp.float32) * (math.pi / 2.0)).reshape(1, dim)

    if B <= 8:
        # Gridless call; times live in SMEM as scalars.
        return pl.pallas_call(
            time_embeddings_smem_kernel,
            out_shape=jax.ShapeDtypeStruct((B, dim), jnp.float32),
            in_specs=[
                pl.BlockSpec(memory_space=pltpu.MemorySpace.SMEM),
                pl.BlockSpec(memory_space=pltpu.MemorySpace.VMEM),
                pl.BlockSpec(memory_space=pltpu.MemorySpace.VMEM),
            ],
            out_specs=pl.BlockSpec(memory_space=pltpu.MemorySpace.VMEM),
        )(times, inv_freq, phase)

    # Large-batch path: parallel grid over row blocks (uses both TCs on v7x).
    TB = min(B, 512)  # ~2.6 MiB output block; fine for v5e/v6e/v7x VMEM
    grid = (pl.cdiv(B, TB),)
    return pl.pallas_call(
        time_embeddings_grid_kernel,
        out_shape=jax.ShapeDtypeStruct((B, dim), jnp.float32),
        grid_spec=pltpu.PrefetchScalarGridSpec(
            num_scalar_prefetch=0,
            grid=grid,
            in_specs=[
                pl.BlockSpec((TB, 1), lambda b: (b, 0)),
                pl.BlockSpec((1, dim), lambda b: (0, 0)),
                pl.BlockSpec((1, dim), lambda b: (0, 0)),
            ],
            out_specs=pl.BlockSpec((TB, dim), lambda b: (b, 0)),
        ),
        compiler_params=pltpu.CompilerParams(
            dimension_semantics=("parallel",)),
    )(times.reshape(B, 1), inv_freq, phase)


# ---------------------------------------------------------------------------
# Pure-JAX reference matching the PyTorch forward
# ---------------------------------------------------------------------------
def reference_forward(times, dim=1280):
    times = jnp.atleast_1d(jnp.asarray(times, jnp.float32))
    i = jnp.arange(dim)
    power = 2.0 * (i // 2).astype(jnp.float32) / dim
    angle_rate = 1.0 / (10000.0 ** power)
    ar = times[:, None] * angle_rate[None, :]
    return jnp.where((i % 2 == 0)[None, :], jnp.sin(ar), jnp.cos(ar))


if __name__ == "__main__":
    DIM = 1280  # module default

    k0, k1, k2 = jax.random.split(jax.random.PRNGKey(0), 3)

    # 1) Exact module case: a single scalar time -> (1, DIM). (SMEM path)
    t_scalar = jax.random.uniform(k0, (), jnp.float32, 0.0, 10.0)
    out1 = jax.block_until_ready(time_embeddings_forward(t_scalar, DIM))
    ref1 = reference_forward(t_scalar, DIM)
    assert out1.shape == (1, DIM)
    assert jnp.allclose(out1, ref1, atol=1e-3, rtol=1e-3), "scalar-time mismatch"

    # 2) Small batch of times (SMEM path, single gridless kernel call).
    t_small = jax.random.uniform(k1, (4,), jnp.float32, 0.0, 10.0)
    out2 = jax.block_until_ready(time_embeddings_forward(t_small, DIM))
    ref2 = reference_forward(t_small, DIM)
    assert out2.shape == (4, DIM)
    assert jnp.allclose(out2, ref2, atol=1e-3, rtol=1e-3), "small-batch mismatch"

    # 3) Larger batch exercises the parallel-grid path.
    t_large = jax.random.uniform(k2, (16,), jnp.float32, 0.0, 10.0)
    out3 = jax.block_until_ready(time_embeddings_forward(t_large, DIM))
    ref3 = reference_forward(t_large, DIM)
    assert out3.shape == (16, DIM)
    assert jnp.allclose(out3, ref3, atol=1e-3, rtol=1e-3), "large-batch mismatch"

    print("KERNEL_OK")
</pallas_src>

<mosaic_0001>
module attributes {stable_mosaic.version = 11 : i64} {
  func.func @time_embeddings_smem_kernel(%arg0: memref<1xf32, #tpu.memory_space<smem>>, %arg1: memref<1x1280xf32, #tpu.memory_space<vmem>>, %arg2: memref<1x1280xf32, #tpu.memory_space<vmem>>, %arg3: memref<1x1280xf32, #tpu.memory_space<vmem>>) attributes {dimension_semantics = [], scalar_prefetch = 0 : i64, scratch_operands = 0 : i64, tpu.core_type = #tpu.core_type<tc>} {
    %c0 = arith.constant 0 : index
    %c0_0 = arith.constant 0 : index
    %0 = vector.load %arg1[%c0, %c0_0] : memref<1x1280xf32, #tpu.memory_space<vmem>>, vector<1x1280xf32>
    %c0_1 = arith.constant 0 : index
    %c0_2 = arith.constant 0 : index
    %1 = vector.load %arg2[%c0_1, %c0_2] : memref<1x1280xf32, #tpu.memory_space<vmem>>, vector<1x1280xf32>
    %c0_3 = arith.constant 0 : index
    %2 = memref.load %arg0[%c0_3] : memref<1xf32, #tpu.memory_space<smem>>
    %3 = vector.broadcast %2 : f32 to vector<1x1280xf32>
    %4 = arith.mulf %3, %0 : vector<1x1280xf32>
    %5 = arith.addf %4, %1 : vector<1x1280xf32>
    %6 = math.sin %5 : vector<1x1280xf32>
    %c0_4 = arith.constant 0 : index
    %c0_5 = arith.constant 0 : index
    %7 = vector.load %arg3[%c0_4, %c0_5] : memref<1x1280xf32, #tpu.memory_space<vmem>>, vector<1x1280xf32>
    tpu.vector_store %arg3[%c0_4, %c0_5], %6 {strides = array<i32>} : memref<1x1280xf32, #tpu.memory_space<vmem>>, vector<1x1280xf32>,
    return
  }
}

</mosaic_0001>

<bundles_post_ra>
// kernel: tpu_custom_call.1
= control target key start
LH: loop header
LB: loop body
LE: loop exit
PB: predicated region body
PF: predicated region fallthrough
CT: control target
= control target key end

     0   :  { %9 = vsyncpa [#allocation4], 0  ;;  %s697_s0 = inlined_call_operand.<no memory space> [shape: f32[1], index: 0, kind: input, shape index: {}]   ;;  %s698_s1 = inlined_call_operand.hbm [shape: f32[1,1280], index: 1, kind: input, shape index: {}]   ;;  %s699_s2 = inlined_call_operand.hbm [shape: f32[1,1280], index: 2, kind: input, shape index: {}]   ;;  %s700_s3 = inlined_call_operand.hbm [shape: f32[1,1280], index: 3, kind: output, shape index: {}]  }
   0x1   :  { %10 = vsyncpa [#allocation7], 0 }
   0x2   :  { %11 = vsyncpa [#allocation5], 0  ;;  %s19_s14 = sshll.u32 %s698_s1, 4  ;;  %s482_s15 = smov [#allocation3]   ;;  %s20_s14 = int_to_ptr.hbm [resolvable:$true] %s19_s14 }
   0x3   :  { %s21_s16 = sshll.u32 %s482_s15, 4  ;;  %s30_s19 = sshll.u32 %s699_s2, 4  ;;  %s22_s16 = int_to_ptr.vmem [resolvable:$true] %s21_s16  ;;  %s31_s19 = int_to_ptr.hbm [resolvable:$true] %s30_s19 }
   0x4   :  { %24 = dma.hbm_to_vmem [thread:$0]  %s20_s14, 160, %s22_s16, [#allocation4]  }
   0x5   :  { %s483_s20 = smov [#allocation6]  }
   0x6   :  { %s32_s21 = sshll.u32 %s483_s20, 4  ;;  %s33_s21 = int_to_ptr.vmem [resolvable:$true] %s32_s21 }
   0x7   :  { %35 = dma.hbm_to_vmem [thread:$0]  %s31_s19, 160, %s33_s21, [#allocation7]  }
   0x8   :  { %476 = dma.done.wait [#allocation4], 160  }
   0x9   :  { %477 = vsyncadd [#allocation4], 4294967136 }
   0xa   :  { %478 = dma.done.wait [#allocation7], 160  }
   0xb   :  { %479 = vsyncadd [#allocation7], 4294967136  ;;  %v49_v0 = vstv %s697_s0  ;;  %v44_v1 = vld [vmem:[#allocation3] sm:$0xff]  ;;  %v45_v2 = vld [vmem:[#allocation3 + $0x8] sm:$0x3]  ;;  %s491_s0 = smov [#allocation8]  }
   0xc   :  { %v46_v3 = vld [vmem:[#allocation6] sm:$0xff]  ;;  %v47_v4 = vld [vmem:[#allocation6 + $0x8] sm:$0x3]  ;;  %v50_v5 = vmul.f32 %v49_v0, %v44_v1  ;;  %v51_v6 = vmul.f32 %v49_v0, %v45_v2  ;;  %v484_v30 = vmov 683565275   ;;  %s375_s2 = sshll.u32 %s491_s0, 4  ;;  %s376_s2 = int_to_ptr.vmem [resolvable:$true] %s375_s2 }
   0xd   :  { %v485_v32 = vmov 2475754826   ;;  %v486_v34 = vmov 2131351028   ;;  %v487_v36 = vmov 2102212464  }
   0xe   :  { %v521_v7 = vadd.f32 %v50_v5, %v46_v3  ;;  %v523_v8 = vadd.f32 %v51_v6, %v47_v4  ;;  %v488_v38 = vmov 920167782   ;;  %v489_v47 = vmov 1326507024   ;;  %s377_s25 = sshll.u32 %s700_s3, 4  ;;  %s378_s25 = int_to_ptr.hbm [resolvable:$true] %s377_s25 }
  0x10   :  { %v54_v9 = vand.u32 2147483647, %v521_v7  ;;  %v57_v10 = vand.u32 2139095040, %v521_v7  ;;  %v209_v11 = vand.u32 2147483647, %v523_v8  ;;  %v212_v12 = vand.u32 2139095040, %v523_v8 }
  0x12   :  { %v58_v13 = vshrl.u32 %v57_v10, 23  ;;  %v61_v14 = vand.u32 8388607, %v54_v9  ;;  %v213_v15 = vshrl.u32 %v212_v12, 23  ;;  %v216_v19 = vand.u32 8388607, %v209_v11 }
  0x14   :  { %v388_v16 = vadd.s32 4294967169, %v58_v13  ;;  %v62_v17 = vor.u32 8388608, %v61_v14  ;;  %v391_v18 = vadd.s32 4294967169, %v213_v15  ;;  %v217_v24 = vor.u32 8388608, %v216_v19 }
  0x16   :  { %v64_v20 = vadd.s32 1, %v388_v16  ;;  %v219_v21 = vadd.s32 1, %v391_v18  ;;  %v533_v23 = vshll.u32 %v62_v17, 8  ;;  %v543_v41 = vshll.u32 %v217_v24, 8 }
  0x18   :  { %vm65_vm0 = vcmp.gt.s32.totalorder %v64_v20, 0  ;;  %vm220_vm1 = vcmp.gt.s32.totalorder %v219_v21, 0  ;;  %v103_v40 = vand.u32 65535, %v533_v23  ;;  %v104_v45 = vshrl.u32 %v533_v23, 16 }
  0x19   :  { %v66_v22 = vsel %vm65_vm0, %v64_v20, 0  ;;  %v221_v26 = vsel %vm220_vm1, %v219_v21, 0 }
  0x1a   :  { %v68_v25 = vand.u32 31, %v66_v22  ;;  %v535_v27 = vshrl.u32 %v66_v22, 5  ;;  %v537_v28 = vand.u32 31, %v221_v26  ;;  %v561_v58 = vshrl.u32 %v221_v26, 5 }
  0x1c   :  { %v69_v29 = vsub.s32 32, %v68_v25  ;;  %v71_v31 = vshll.u32 %v484_v30, %v68_v25  ;;  %v74_v33 = vshll.u32 %v485_v32, %v68_v25  ;;  %v77_v35 = vshll.u32 %v486_v34, %v68_v25 }
  0x1d   :  { %v80_v37 = vshll.u32 %v487_v36, %v68_v25  ;;  %v83_v39 = vshll.u32 %v488_v38, %v68_v25  ;;  %vm86_vm2 = vcmp.lt.s32.totalorder %v535_v27, 1  ;;  %vm89_vm3 = vcmp.lt.s32.totalorder %v535_v27, 4 }
  0x1e   :  { %v72_v42 = vshrl.u32 %v485_v32, %v69_v29  ;;  %v75_v43 = vshrl.u32 %v486_v34, %v69_v29  ;;  %v78_v44 = vshrl.u32 %v487_v36, %v69_v29  ;;  %v81_v46 = vshrl.u32 %v488_v38, %v69_v29 }
  0x1f   :  { %v84_v48 = vshrl.u32 %v489_v47, %v69_v29  ;;  %v552_v52 = vsub.s32 32, %v537_v28  ;;  %v70_v53 = vshrl.u32 %v484_v30, %v69_v29  ;;  %vm88_vm4 = vcmp.lt.s32.totalorder %v535_v27, 3 }
  0x20   :  { %v73_v49 = vor.u32 %v72_v42, %v71_v31  ;;  %v76_v50 = vor.u32 %v75_v43, %v74_v33  ;;  %v79_v51 = vor.u32 %v78_v44, %v77_v35  ;;  %v82_v54 = vor.u32 %v81_v46, %v80_v37 }
  0x21   :  { %v85_v55 = vor.u32 %v84_v48, %v83_v39  ;;  %vm87_vm5 = vcmp.lt.s32.totalorder %v535_v27, 2  ;;  %v226_v61 = vshll.u32 %v484_v30, %v537_v28  ;;  %v229_v62 = vshll.u32 %v485_v32, %v537_v28 }
  0x22   :  { %v94_v56 = vsel %vm86_vm2, %v73_v49, %v76_v50  ;;  %v98_v57 = vsel %vm86_vm2, %v76_v50, %v79_v51  ;;  %v95_v59 = vsel %vm89_vm3, %v82_v54, 920167782  ;;  %v91_v63 = vsel %vm89_vm3, %v79_v51, 2102212464 }
  0x23   :  { %v99_v60 = vsel %vm89_vm3, %v85_v55, 1326507024  ;;  %v96_v0 = vsel %vm88_vm4, %v79_v51, %v95_v59  ;;  %v227_v2 = vshrl.u32 %v485_v32, %v552_v52  ;;  %v90_v3 = vsel %vm86_vm2, %v70_v53, %v73_v49 }
  0x24   :  { %v100_v1 = vsel %vm88_vm4, %v82_v54, %v99_v60  ;;  %v97_v4 = vsel %vm87_vm5, %v94_v56, %v96_v0  ;;  %v230_v6 = vshrl.u32 %v486_v34, %v552_v52  ;;  %v92_v15 = vsel %vm88_vm4, %v76_v50, %v91_v63 }
  0x25   :  { %v101_v5 = vsel %vm87_vm5, %v98_v57, %v100_v1  ;;  %v127_v13 = vand.u32 65535, %v97_v4  ;;  %v128_v14 = vshrl.u32 %v97_v4, 16  ;;  %v586_v16 = vor.u32 %v227_v2, %v226_v61 }
  0x26   :  { %v105_v10 = vand.u32 65535, %v101_v5  ;;  %v106_v12 = vshrl.u32 %v101_v5, 16  ;;  %v588_v17 = vor.u32 %v230_v6, %v229_v62  ;;  %v232_v18 = vshll.u32 %v486_v34, %v537_v28 }
  0x27   :  { %v233_v22 = vshrl.u32 %v487_v36, %v552_v52  ;;  %v129_v25 = vmul.u32 %v127_v13, %v103_v40  ;;  %v130_v26 = vmul.u32 %v128_v14, %v103_v40  ;;  %v131_v29 = vmul.u32 %v127_v13, %v104_v45 }
  0x28   :  { %v107_v19 = vmul.u32 %v105_v10, %v103_v40  ;;  %v108_v20 = vmul.u32 %v106_v12, %v103_v40  ;;  %v109_v21 = vmul.u32 %v105_v10, %v104_v45  ;;  %v110_v24 = vmul.u32 %v106_v12, %v104_v45 }
  0x29   :  { %v132_v35 = vmul.u32 %v128_v14, %v104_v45  ;;  %v133_v39 = vshll.u32 %v130_v26, 16  ;;  %v134_v42 = vshrl.u32 %v130_v26, 16  ;;  %v135_v43 = vshll.u32 %v131_v29, 16 }
  0x2a   :  { %v111_v31 = vshll.u32 %v108_v20, 16  ;;  %v112_v32 = vshrl.u32 %v108_v20, 16  ;;  %v113_v33 = vshll.u32 %v109_v21, 16  ;;  %v114_v37 = vshrl.u32 %v109_v21, 16 }
  0x2b   :  { %v136_v44 = vshrl.u32 %v131_v29, 16  ;;  %v235_v46 = vshll.u32 %v487_v36, %v537_v28  ;;  %v490_v48 = vmov 0   ;;  %vm137_vm7 = vc.u32 %v129_v25, %v133_v39 }
  0x2c   :  { %vm115_vm6 = vc.u32 %v107_v19, %v111_v31  ;;  %v117_v34 = vadd.s32 %v111_v31, %v107_v19  ;;  %v139_v40 = vadd.s32 %v133_v39, %v129_v25  ;;  %v236_v50 = vshrl.u32 %v488_v38, %v552_v52 }
  0x2d   :  { %v116_v49 = vsel %vm115_vm6, 1, %v490_v48  ;;  %v138_v45 = vsel %vm137_vm7, 1, %v490_v48  ;;  %v238_v53 = vshll.u32 %v488_v38, %v537_v28  ;;  %v234_v36 = vor.u32 %v233_v22, %v232_v18 }
  0x2e   :  { %v118_v51 = vadd.s32 %v116_v49, %v110_v24  ;;  %vm119_vm8 = vc.u32 %v117_v34, %v113_v33  ;;  %v140_v55 = vadd.s32 %v138_v45, %v132_v35  ;;  %vm141_vm9 = vc.u32 %v139_v40, %v135_v43 }
  0x2f   :  { %v120_v54 = vsel %vm119_vm8, 1, %v490_v48  ;;  %v142_v57 = vsel %vm141_vm9, 1, %v490_v48  ;;  %v237_v59 = vor.u32 %v236_v50, %v235_v46  ;;  %v239_v60 = vshrl.u32 %v489_v47, %v552_v52 }
  0x30   :  { %v122_v56 = vadd.s32 %v120_v54, %v118_v51  ;;  %v605_v61 = vadd.s32 %v139_v40, %v135_v43  ;;  %v144_v62 = vadd.s32 %v142_v57, %v140_v55  ;;  %vm241_vm10 = vcmp.lt.s32.totalorder %v561_v58, 1 }
  0x31   :  { %vm243_vm11 = vcmp.lt.s32.totalorder %v561_v58, 3  ;;  %v240_v38 = vor.u32 %v239_v60, %v238_v53  ;;  %vm242_vm12 = vcmp.lt.s32.totalorder %v561_v58, 2  ;;  %vm244_vm13 = vcmp.lt.s32.totalorder %v561_v58, 4 }
  0x32   :  { %v123_v28 = vadd.s32 %v122_v56, %v112_v32  ;;  %v93_v63 = vsel %vm87_vm5, %v90_v3, %v92_v15  ;;  %v145_v0 = vadd.s32 %v144_v62, %v134_v42  ;;  %v249_v47 = vsel %vm241_vm10, %v586_v16, %v588_v17 }
  0x33   :  { %v250_v1 = vsel %vm244_vm13, %v237_v59, 920167782  ;;  %v253_v5 = vsel %vm241_vm10, %v588_v17, %v234_v36  ;;  %v258_v27 = vand.u32 65535, %v543_v41  ;;  %v254_v10 = vsel %vm244_vm13, %v240_v38, 1326507024 }
  0x34   :  { %v619_v2 = vadd.s32 %v123_v28, %v114_v37  ;;  %v251_v4 = vsel %vm243_vm11, %v234_v36, %v250_v1  ;;  %v146_v3 = vadd.s32 %v145_v0, %v136_v44  ;;  %v259_v12 = vshrl.u32 %v543_v41, 16 }
  0x35   :  { %v252_v6 = vsel %vm242_vm12, %v249_v47, %v251_v4  ;;  %v147_v13 = vmul.u32 %v533_v23, %v93_v63  ;;  %v255_v14 = vsel %vm243_vm11, %v237_v59, %v254_v10  ;;  %v225_v25 = vshrl.u32 %v484_v30, %v552_v52 }
  0x36   :  { %vm149_vm14 = vc.u32 %v619_v2, %v605_v61  ;;  %v282_v15 = vand.u32 65535, %v252_v6  ;;  %v150_v18 = vadd.s32 1, %v146_v3  ;;  %v256_v19 = vsel %vm242_vm12, %v253_v5, %v255_v14 }
  0x37   :  { %v283_v20 = vshrl.u32 %v252_v6, 16  ;;  %v260_v21 = vand.u32 65535, %v256_v19  ;;  %v261_v22 = vshrl.u32 %v256_v19, 16  ;;  %v246_v42 = vsel %vm244_vm13, %v234_v36, 2102212464 }
  0x38   :  { %v151_v24 = vsel %vm149_vm14, %v150_v18, %v146_v3  ;;  %v286_v23 = vmul.u32 %v282_v15, %v259_v12  ;;  %v284_v33 = vmul.u32 %v282_v15, %v258_v27  ;;  %v245_v44 = vsel %vm241_vm10, %v225_v25, %v586_v16 }
  0x39   :  { %v285_v26 = vmul.u32 %v283_v20, %v258_v27  ;;  %v152_v29 = vadd.s32 %v151_v24, %v147_v13  ;;  %v262_v31 = vmul.u32 %v260_v21, %v258_v27  ;;  %v263_v32 = vmul.u32 %v261_v22, %v258_v27 }
  0x3a   :  { %v264_v35 = vmul.u32 %v260_v21, %v259_v12  ;;  %v265_v43 = vmul.u32 %v261_v22, %v259_v12  ;;  %v287_v30 = vmul.u32 %v283_v20, %v259_v12  ;;  %v290_v52 = vshll.u32 %v286_v23, 16 }
  0x3b   :  { %v288_v37 = vshll.u32 %v285_v26, 16  ;;  %v153_v39 = vadd.s32 536870912, %v152_v29  ;;  %v266_v34 = vshll.u32 %v263_v32, 16  ;;  %v247_v50 = vsel %vm243_vm11, %v588_v17, %v246_v42 }
  0x3c   :  { %v268_v46 = vshll.u32 %v264_v35, 16  ;;  %v267_v16 = vshrl.u32 %v263_v32, 16  ;;  %v289_v56 = vshrl.u32 %v285_v26, 16  ;;  %v269_v60 = vshrl.u32 %v264_v35, 16 }
  0x3d   :  { %v646_v49 = vshrl.u32 %v153_v39, 30  ;;  %vm270_vm15 = vc.u32 %v262_v31, %v266_v34  ;;  %v272_v40 = vadd.s32 %v266_v34, %v262_v31  ;;  %vm292_vm0 = vc.u32 %v284_v33, %v288_v37 }
  0x3e   :  { %v271_v51 = vsel %vm270_vm15, 1, %v490_v48  ;;  %v293_v45 = vsel %vm292_vm0, 1, %v490_v48  ;;  %v294_v53 = vadd.s32 %v288_v37, %v284_v33  ;;  %v291_v28 = vshrl.u32 %v286_v23, 16 }
  0x3f   :  { %v155_v54 = vshll.u32 %v646_v49, 30  ;;  %v273_v55 = vadd.s32 %v271_v51, %v265_v43  ;;  %vm274_vm1 = vc.u32 %v272_v40, %v268_v46  ;;  %v295_v57 = vadd.s32 %v293_v45, %v287_v30 }
  0x40   :  { %v275_v36 = vsel %vm274_vm1, 1, %v490_v48  ;;  %vm296_vm2 = vc.u32 %v294_v53, %v290_v52  ;;  %v298_v47 = vadd.s32 %v294_v53, %v290_v52  ;;  %v248_v1 = vsel %vm242_vm12, %v245_v44, %v247_v50 }
  0x41   :  { %v156_v59 = vsub.s32 %v152_v29, %v155_v54  ;;  %v277_v62 = vadd.s32 %v275_v36, %v273_v55  ;;  %v297_v17 = vsel %vm296_vm2, 1, %v490_v48  ;;  %v302_v10 = vmul.u32 %v543_v41, %v248_v1 }
  0x42   :  { %v299_v38 = vadd.s32 %v297_v17, %v295_v57  ;;  %v148_v48 = vadd.s32 %v605_v61, %v619_v2  ;;  %v178_v35 = vsub.s32 4, %v646_v49  ;;  %vm56_vm7 = vcmp.lt.s32.totalorder %v521_v7, 0 }
  0x43   :  { %vm157_vm3 = vcmp.lt.s32.totalorder %v156_v59, 0  ;;  %v158_v63 = vsub.s32 0, %v156_v59  ;;  %v278_v0 = vadd.s32 %v277_v62, %v267_v16  ;;  %vm668_vm8 = vcmp.le.f32.partialorder %v54_v9, 0.7853982 }
  0x44   :  { %v300_v4 = vadd.s32 %v299_v38, %v289_v56  ;;  %v179_v44 = vsel %vm56_vm7, %v178_v35, %v646_v49  ;;  %vm211_vm11 = vcmp.lt.s32.totalorder %v523_v8, 0  ;;  %vm682_vm13 = vcmp.le.f32.partialorder %v209_v11, 0.7853982 }
  0x45   :  { %v159_v5 = vsel %vm157_vm3, %v158_v63, %v156_v59  ;;  %v279_v27 = vadd.s32 %v278_v0, %v269_v60  ;;  %v181_v50 = vsel %vm668_vm8, 0, %v179_v44  ;;  %vm197_vm15 = vweird.f32 %v521_v7 }
  0x46   :  { %v160_v3 = vclz %v159_v5  ;;  %v301_v6 = vadd.s32 %v300_v4, %v291_v28  ;;  %v198_v56 = vadd.s32 3, %v181_v50  ;;  %v365_v44 = vlaneseq }
  0x47   :  { %vm304_vm4 = vc.u32 %v279_v27, %v298_v47  ;;  %v303_v40 = vadd.s32 %v298_v47, %v279_v27  ;;  %vm352_vm3 = vweird.f32 %v523_v8 }
  0x48   :  { %v389_v12 = vadd.s32 4294967294, %v160_v3  ;;  %v305_v13 = vadd.s32 1, %v301_v6  ;;  %v199_v63 = vand.u32 3, %v198_v56 }
  0x4a   :  { %vm390_vm5 = vcmp.lt.s32.totalorder %v389_v12, 0  ;;  %v306_v14 = vsel %vm304_vm4, %v305_v13, %v301_v6  ;;  %vm204_vm10 = vcmp.eq.s32.totalorder %v199_v63, 2  ;;  %vm201_vm12 = vcmp.eq.s32.totalorder %v199_v63, 0 }
  0x4b   :  { %v163_v15 = vsel %vm390_vm5, 0, %v389_v12  ;;  %v307_v18 = vadd.s32 %v306_v14, %v302_v10  ;;  %vm200_vm14 = vcmp.lt.s32.totalorder %v199_v63, 2  ;;  %vm367_vm4 = vcmp.lt.s32.totalorder %v365_v44, 256 }
  0x4c   :  { %v164_v19 = vsub.s32 32, %v163_v15  ;;  %v165_v58 = vshll.u32 %v156_v59, %v163_v15  ;;  %v168_v20 = vsub.s32 4294967266, %v163_v15 }
  0x4d   :  { %v308_v21 = vadd.s32 536870912, %v307_v18 }
  0x4e   :  { %v166_v22 = vshrl.u32 %v148_v48, %v164_v19  ;;  %v169_v24 = vadd.s32 127, %v168_v20 }
  0x4f   :  { %v661_v25 = vshrl.u32 %v308_v21, 30 }
  0x50   :  { %v167_v26 = vor.u32 %v166_v22, %v165_v58  ;;  %v170_v41 = vshll.u32 %v169_v24, 23 }
  0x51   :  { %v310_v23 = vshll.u32 %v661_v25, 30  ;;  %v333_v13 = vsub.s32 4, %v661_v25 }
  0x52   :  { %v171_v29 = vor.u32 4788187, %v170_v41  ;;  %v174_v31 = vcvt.s32.f32 %v167_v26 }
  0x53   :  { %v311_v32 = vsub.s32 %v307_v18, %v310_v23  ;;  %v334_v20 = vsel %vm211_vm11, %v333_v13, %v661_v25 }
  0x54   :  { %v172_v61 = vand.u32 2147483647, %v171_v29  ;;  %v336_v26 = vsel %vm682_vm13, 0, %v334_v20 }
  0x55   :  { %vm312_vm6 = vcmp.lt.s32.totalorder %v311_v32, 0  ;;  %v313_v2 = vsub.s32 0, %v311_v32 }
  0x56   :  { %v175_v33 = vmul.f32 %v174_v31, %v172_v61 }
  0x57   :  { %v314_v37 = vsel %vm312_vm6, %v313_v2, %v311_v32 }
  0x58   :  { %v176_v42 = vxor.u32 2147483648, %v175_v33  ;;  %v315_v43 = vclz %v314_v37 }
  0x5a   :  { %v177_v34 = vsel %vm56_vm7, %v176_v42, %v175_v33  ;;  %v392_v46 = vadd.s32 4294967294, %v315_v43 }
  0x5b   :  { %v180_v30 = vsel %vm668_vm8, %v521_v7, %v177_v34  ;;  %v353_v7 = vadd.s32 3, %v336_v26 }
  0x5c   :  { %v182_v52 = vmul.f32 %v180_v30, %v180_v30  ;;  %vm393_vm9 = vcmp.lt.s32.totalorder %v392_v46, 0 }
  0x5d   :  { %v318_v9 = vsel %vm393_vm9, 0, %v392_v46  ;;  %v354_v33 = vand.u32 3, %v353_v7 }
  0x5e   :  { %v183_v51 = vmul.f32 -0.001358992, %v182_v52  ;;  %v190_v45 = vmul.f32 -0.00019511016, %v182_v52  ;;  %v319_v53 = vsub.s32 32, %v318_v9  ;;  %v320_v54 = vshll.u32 %v311_v32, %v318_v9 }
  0x5f   :  { %v323_v16 = vsub.s32 4294967266, %v318_v9  ;;  %vm359_vm0 = vcmp.eq.s32.totalorder %v354_v33, 2  ;;  %vm356_vm1 = vcmp.eq.s32.totalorder %v354_v33, 0  ;;  %vm355_vm2 = vcmp.lt.s32.totalorder %v354_v33, 2 }
  0x60   :  { %v184_v55 = vadd.f32 0.041655596, %v183_v51  ;;  %v191_v36 = vadd.f32 0.008332121, %v190_v45  ;;  %v321_v49 = vshrl.u32 %v303_v40, %v319_v53 }
  0x61   :  { %v324_v57 = vadd.s32 127, %v323_v16 }
  0x62   :  { %v185_v59 = vmul.f32 %v184_v55, %v182_v52  ;;  %v192_v60 = vmul.f32 %v191_v36, %v182_v52  ;;  %v322_v62 = vor.u32 %v321_v49, %v320_v54 }
  0x63   :  { %v325_v17 = vshll.u32 %v324_v57, 23 }
  0x64   :  { %v186_v28 = vadd.f32 -0.4999988, %v185_v59  ;;  %v193_v38 = vadd.f32 -0.16666654, %v192_v60  ;;  %v329_v47 = vcvt.s32.f32 %v322_v62 }
  0x65   :  { %v326_v0 = vor.u32 4788187, %v325_v17 }
  0x66   :  { %v187_v1 = vmul.f32 %v186_v28, %v182_v52  ;;  %v194_v4 = vmul.f32 %v193_v38, %v182_v52 }
  0x67   :  { %v327_v5 = vand.u32 2147483647, %v326_v0 }
  0x68   :  { %v188_v27 = vadd.f32 1.0, %v187_v1  ;;  %v195_v3 = vadd.f32 1.0, %v194_v4 }
  0x69   :  { %v330_v6 = vmul.f32 %v329_v47, %v327_v5 }
  0x6a   :  { %v196_v10 = vmul.f32 %v195_v3, %v180_v30  ;;  %v205_v12 = vxor.u32 2147483648, %v188_v27 }
  0x6b   :  { %v331_v14 = vxor.u32 2147483648, %v330_v6 }
  0x6c   :  { %v202_v15 = vxor.u32 2147483648, %v196_v10  ;;  %v206_v18 = vsel %vm204_vm10, %v205_v12, %v196_v10 }
  0x6d   :  { %v332_v19 = vsel %vm211_vm11, %v331_v14, %v330_v6 }
  0x6e   :  { %v203_v58 = vsel %vm201_vm12, %v188_v27, %v202_v15  ;;  %v335_v21 = vsel %vm682_vm13, %v523_v8, %v332_v19 }
  0x6f   :  { %v207_v22 = vsel %vm200_vm14, %v203_v58, %v206_v18  ;;  %v337_v24 = vmul.f32 %v335_v21, %v335_v21 }
  0x70   :  { %v208_v11 = vsel %vm197_vm15, nan, %v207_v22 }
  0x71   :  { %v338_v41 = vmul.f32 -0.001358992, %v337_v24  ;;  %v345_v23 = vmul.f32 -0.00019511016, %v337_v24  ;;  %364 = vst [vmem:[#allocation8] sm:$0xff] %v208_v11 }
  0x73   :  { %v339_v29 = vadd.f32 0.041655596, %v338_v41  ;;  %v346_v31 = vadd.f32 0.008332121, %v345_v23 }
  0x75   :  { %v340_v32 = vmul.f32 %v339_v29, %v337_v24  ;;  %v347_v61 = vmul.f32 %v346_v31, %v337_v24 }
  0x77   :  { %v341_v2 = vadd.f32 -0.4999988, %v340_v32  ;;  %v348_v25 = vadd.f32 -0.16666654, %v347_v61 }
  0x79   :  { %v342_v35 = vmul.f32 %v341_v2, %v337_v24  ;;  %v349_v37 = vmul.f32 %v348_v25, %v337_v24 }
  0x7b   :  { %v343_v39 = vadd.f32 1.0, %v342_v35  ;;  %v350_v42 = vadd.f32 1.0, %v349_v37 }
  0x7d   :  { %v351_v43 = vmul.f32 %v350_v42, %v335_v21  ;;  %v360_v34 = vxor.u32 2147483648, %v343_v39 }
  0x7f   :  { %v357_v46 = vxor.u32 2147483648, %v351_v43  ;;  %v361_v30 = vsel %vm359_vm0, %v360_v34, %v351_v43 }
  0x81   :  { %v358_v52 = vsel %vm356_vm1, %v343_v39, %v357_v46 }
  0x82   :  { %v362_v40 = vsel %vm355_vm2, %v358_v52, %v361_v30 }
  0x83   :  { %v363_v50 = vsel %vm352_vm3, nan, %v362_v40 }
  0x84   :  { %369 = vst.msk [vmem:[#allocation8 + $0x8] sm:$0x3] %vm367_vm4, %v363_v50 }
  0x85   :  { %380 = dma.vmem_to_hbm [thread:$0]  %s376_s2, 160, %s378_s25, [#allocation5]  }
  0x86   :  { %480 = dma.done.wait [#allocation5], 160  }
  0x87   :  { %481 = vsyncadd [#allocation5], 4294967136 }
  0x88   :  { %385 = vsyncpa [#allocation4], 1 }
  0x89   :  { %386 = vsyncpa [#allocation7], 1 }
  0x8a   :  { %387 = vsyncpa [#allocation5], 1 }

</bundles_post_ra>
